<compile_context>
chip_gen: v6e
topology: v6e:2x2x1
jax: 0.10.0
libtpu: 0.0.40
codegen_flags: <defaults>
</compile_context>

<pallas_src>
import functools

import jax
import jax.numpy as jnp
from jax.experimental import pallas as pl
from jax.experimental.pallas import tpu as pltpu


def critic_kernel(xT_ref, w1_ref, b1_ref, w2_ref, b2_ref, w3_ref, b3_ref, o_ref):
    xT = xT_ref[...]                                                    # (in, TB)
    # lin1: (hidden, in) @ (in, TB) -> (hidden, TB); bias broadcasts over lanes.
    h1 = jnp.dot(w1_ref[...], xT, preferred_element_type=jnp.float32) + b1_ref[...]
    a1 = jnp.maximum(h1, 0.0)                                           # relu(lin1)
    # lin2 is applied to the pre-activation h1 (matches the PyTorch module:
    # nn.ReLU is not in-place, so lin2 sees the un-mutated lin1 output).
    h2 = jnp.dot(w2_ref[...], h1, preferred_element_type=jnp.float32) + b2_ref[...]
    a2 = jnp.maximum(h2, 0.0)
    z = a2 + a1                                                         # x += x_1

    # Final Linear(hidden -> 1): (1, hidden) @ (hidden, TB) -> (1, TB).
    # Result is already lane-dense (batch on lanes) -> unmasked vst.
    y = jnp.dot(w3_ref[...], z, preferred_element_type=jnp.float32) + b3_ref[0]
    o_ref[...] = y.astype(o_ref.dtype)


def _pick_block_batch(B, cap=2048):
    """Largest batch tile <= cap that is a multiple of 128 and divides B;
    falls back to the whole batch (single tile) if no such divisor exists."""
    if B <= cap:
        return B
    bb = (cap // 128) * 128
    while bb >= 128:
        if B % bb == 0:
            return bb
        bb -= 128
    return B


def critic_forward(x, params, *, block_batch=None):
    """x: (B, in_size) float32.

    params (PyTorch-native weight layout, feature-major biases):
      w1: (hidden, in)      b1: (hidden, 1)
      w2: (hidden, hidden)  b2: (hidden, 1)
      w3: (1, hidden)       b3: (1,)        # final-layer row + scalar bias
    Returns (B, 1) float32.
    """
    B, in_size = x.shape
    hidden = params["w1"].shape[0]

    if block_batch is None:
        block_batch = _pick_block_batch(B)
    assert B % block_batch == 0, "batch must be divisible by block_batch"
    num_tiles = B // block_batch

    # Feature-major activations: ideally the caller stores x transposed; here
    # we transpose once in the wrapper (cheap XLA relayout, in_size is tiny).
    xT = jnp.transpose(x)                                               # (in, B)

    def rep(shape):  # replicated (whole-array) parameter block
        return pl.BlockSpec(shape, lambda i, _s=shape: tuple(0 for _ in _s))

    out = pl.pallas_call(
        critic_kernel,
        # Lane-dense output: one (1, TB) row per grid step, batch along lanes.
        out_shape=jax.ShapeDtypeStruct((1, B), jnp.float32),
        grid=(num_tiles,),
        in_specs=[
            # x tile, contiguous rows of 4*TB bytes; sweep pl.Buffered(3) here
            # for very long grids if the DMA stays exposed.
            pl.BlockSpec((in_size, block_batch), lambda i: (0, i)),
            rep((hidden, in_size)),                                     # W1
            rep((hidden, 1)),                                           # b1
            rep((hidden, hidden)),                                      # W2
            rep((hidden, 1)),                                           # b2
            rep((1, hidden)),                                           # W3 row
            pl.BlockSpec(memory_space=pltpu.MemorySpace.SMEM),          # b3 scalar
        ],
        out_specs=pl.BlockSpec((1, block_batch), lambda i: (0, i)),
        compiler_params=pltpu.CompilerParams(
            dimension_semantics=("parallel",)),
    )(xT, params["w1"], params["b1"], params["w2"], params["b2"],
      params["w3"], params["b3"])

    return out.reshape(B, 1)


def init_params(key, hidden_size, action_size, state_size):
    """Deterministic init mimicking nn.Linear default (uniform +/- 1/sqrt(fan_in)).
    Weights kept in PyTorch's (out_features, in_features) layout; biases stored
    feature-major as (out_features, 1) columns; b3 as a (1,) scalar."""
    in_size = action_size + state_size
    ks = jax.random.split(key, 6)

    def lin(kw, kb, fan_in, fan_out):
        bound = 1.0 / jnp.sqrt(fan_in)
        w = jax.random.uniform(kw, (fan_out, fan_in), jnp.float32, -bound, bound)
        b = jax.random.uniform(kb, (fan_out, 1), jnp.float32, -bound, bound)
        return w, b

    w1, b1 = lin(ks[0], ks[1], in_size, hidden_size)
    w2, b2 = lin(ks[2], ks[3], hidden_size, hidden_size)
    w3, b3 = lin(ks[4], ks[5], hidden_size, 1)
    return {
        "w1": w1, "b1": b1,
        "w2": w2, "b2": b2,
        "w3": w3,                         # (1, hidden)
        "b3": b3.reshape((1,)),           # scalar bias for SMEM
    }


def critic_reference(x, p):
    h1 = x @ p["w1"].T + p["b1"].T
    a1 = jnp.maximum(h1, 0.0)
    h2 = h1 @ p["w2"].T + p["b2"].T       # pre-ReLU h1 feeds lin2 (matches PyTorch)
    a2 = jnp.maximum(h2, 0.0)
    z = a2 + a1
    return z @ p["w3"].T + p["b3"]        # (B, 1)


if __name__ == "__main__":
    hidden_size = 32
    action_size = 8
    state_size = 24
    in_size = action_size + state_size

    key = jax.random.PRNGKey(0)
    kx1, kx2, kp = jax.random.split(key, 3)
    params = init_params(kp, hidden_size, action_size, state_size)

    # Single-tile path (grid=(1,)).
    batch = 128
    x = jax.random.normal(kx1, (batch, in_size), jnp.float32)
    ref = critic_reference(x, params)
    run = jax.jit(critic_forward)
    out = jax.block_until_ready(run(x, params))
    assert out.shape == (batch, 1)
    assert jnp.allclose(out, ref, atol=1e-5, rtol=1e-5)

    # Multi-tile path (grid=(2,), parallel over batch tiles) stays correct.
    batch2 = 256
    x2 = jax.random.normal(kx2, (batch2, in_size), jnp.float32)
    ref2 = critic_reference(x2, params)
    run_tiled = jax.jit(functools.partial(critic_forward, block_batch=128))
    out2 = jax.block_until_ready(run_tiled(x2, params))
    assert out2.shape == (batch2, 1)
    assert jnp.allclose(out2, ref2, atol=1e-5, rtol=1e-5)

    print("KERNEL_OK")
</pallas_src>

<mosaic_0001>
module attributes {stable_mosaic.version = 11 : i64} {
  func.func @critic_kernel(%arg0: i32, %arg1: memref<32x128xf32, #tpu.memory_space<vmem>>, %arg2: memref<32x32xf32, #tpu.memory_space<vmem>>, %arg3: memref<32x1xf32, #tpu.memory_space<vmem>>, %arg4: memref<32x32xf32, #tpu.memory_space<vmem>>, %arg5: memref<32x1xf32, #tpu.memory_space<vmem>>, %arg6: memref<1x32xf32, #tpu.memory_space<vmem>>, %arg7: memref<1xf32, #tpu.memory_space<smem>>, %arg8: memref<1x128xf32, #tpu.memory_space<vmem>>) attributes {dimension_semantics = [#tpu.dimension_semantics<parallel>], iteration_bounds = array<i64: 1>, scalar_prefetch = 0 : i64, scratch_operands = 0 : i64, tpu.core_type = #tpu.core_type<tc>, window_params = [{transform_indices = @transform_0, window_bounds = array<i64: 32, 128>}, {pipeline_mode = #tpu.pipeline_mode<synchronous>, transform_indices = @transform_1, window_bounds = array<i64: 32, 32>}, {pipeline_mode = #tpu.pipeline_mode<synchronous>, transform_indices = @transform_2, window_bounds = array<i64: 32, 1>}, {pipeline_mode = #tpu.pipeline_mode<synchronous>, transform_indices = @transform_3, window_bounds = array<i64: 32, 32>}, {pipeline_mode = #tpu.pipeline_mode<synchronous>, transform_indices = @transform_4, window_bounds = array<i64: 32, 1>}, {pipeline_mode = #tpu.pipeline_mode<synchronous>, transform_indices = @transform_5, window_bounds = array<i64: 1, 32>}, {transform_indices = @transform_6, window_bounds = array<i64: 1>}, {transform_indices = @transform_7, window_bounds = array<i64: 1, 128>}]} {
    %c0 = arith.constant 0 : index
    %c0_0 = arith.constant 0 : index
    %0 = vector.load %arg1[%c0, %c0_0] : memref<32x128xf32, #tpu.memory_space<vmem>>, vector<32x128xf32>
    %c0_1 = arith.constant 0 : index
    %c0_2 = arith.constant 0 : index
    %1 = vector.load %arg2[%c0_1, %c0_2] : memref<32x32xf32, #tpu.memory_space<vmem>>, vector<32x32xf32>
    %cst = arith.constant dense<0.000000e+00> : vector<32x128xf32>
    %2 = tpu.matmul %1, %0, %cst {dimension_numbers = #tpu.dot_dimension_numbers<[1], [0], [0], [1], [0, 0, 1, 1], [], []>} : vector<32x32xf32>, vector<32x128xf32>, vector<32x128xf32> -> vector<32x128xf32>
    %c0_3 = arith.constant 0 : index
    %c0_4 = arith.constant 0 : index
    %3 = vector.load %arg3[%c0_3, %c0_4] : memref<32x1xf32, #tpu.memory_space<vmem>>, vector<32x1xf32>
    %4 = vector.broadcast %3 : vector<32x1xf32> to vector<32x128xf32>
    %5 = arith.addf %2, %4 : vector<32x128xf32>
    %cst_5 = arith.constant 0.000000e+00 : f32
    %6 = vector.broadcast %cst_5 : f32 to vector<32x128xf32>
    %7 = arith.maximumf %5, %6 : vector<32x128xf32>
    %c0_6 = arith.constant 0 : index
    %c0_7 = arith.constant 0 : index
    %8 = vector.load %arg4[%c0_6, %c0_7] : memref<32x32xf32, #tpu.memory_space<vmem>>, vector<32x32xf32>
    %cst_8 = arith.constant dense<0.000000e+00> : vector<32x128xf32>
    %9 = tpu.matmul %8, %5, %cst_8 {dimension_numbers = #tpu.dot_dimension_numbers<[1], [0], [0], [1], [0, 0, 1, 1], [], []>} : vector<32x32xf32>, vector<32x128xf32>, vector<32x128xf32> -> vector<32x128xf32>
    %c0_9 = arith.constant 0 : index
    %c0_10 = arith.constant 0 : index
    %10 = vector.load %arg5[%c0_9, %c0_10] : memref<32x1xf32, #tpu.memory_space<vmem>>, vector<32x1xf32>
    %11 = vector.broadcast %10 : vector<32x1xf32> to vector<32x128xf32>
    %12 = arith.addf %9, %11 : vector<32x128xf32>
    %cst_11 = arith.constant 0.000000e+00 : f32
    %13 = vector.broadcast %cst_11 : f32 to vector<32x128xf32>
    %14 = arith.maximumf %12, %13 : vector<32x128xf32>
    %15 = arith.addf %14, %7 : vector<32x128xf32>
    %c0_12 = arith.constant 0 : index
    %c0_13 = arith.constant 0 : index
    %16 = vector.load %arg6[%c0_12, %c0_13] : memref<1x32xf32, #tpu.memory_space<vmem>>, vector<1x32xf32>
    %cst_14 = arith.constant dense<0.000000e+00> : vector<1x128xf32>
    %17 = tpu.matmul %16, %15, %cst_14 {dimension_numbers = #tpu.dot_dimension_numbers<[1], [0], [0], [1], [0, 0, 1, 1], [], []>} : vector<1x32xf32>, vector<32x128xf32>, vector<1x128xf32> -> vector<1x128xf32>
    %c0_15 = arith.constant 0 : index
    %18 = memref.load %arg7[%c0_15] : memref<1xf32, #tpu.memory_space<smem>>
    %19 = vector.broadcast %18 : f32 to vector<1x128xf32>
    %20 = arith.addf %17, %19 : vector<1x128xf32>
    %c0_16 = arith.constant 0 : index
    %c0_17 = arith.constant 0 : index
    %21 = vector.load %arg8[%c0_16, %c0_17] : memref<1x128xf32, #tpu.memory_space<vmem>>, vector<1x128xf32>
    tpu.vector_store %arg8[%c0_16, %c0_17], %20 {strides = array<i32>} : memref<1x128xf32, #tpu.memory_space<vmem>>, vector<1x128xf32>,
    return
  }
  func.func @transform_0(%arg0: i32) -> (i32, i32) {
    %c0_i32 = arith.constant 0 : i32
    %c0_i32_0 = arith.constant 0 : i32
    return %c0_i32, %arg0 : i32, i32
  }
  func.func @transform_1(%arg0: i32) -> (i32, i32) {
    %c0_i32 = arith.constant 0 : i32
    %c0_i32_0 = arith.constant 0 : i32
    %c0_i32_1 = arith.constant 0 : i32
    return %c0_i32, %c0_i32_0 : i32, i32
  }
  func.func @transform_2(%arg0: i32) -> (i32, i32) {
    %c0_i32 = arith.constant 0 : i32
    %c0_i32_0 = arith.constant 0 : i32
    %c0_i32_1 = arith.constant 0 : i32
    return %c0_i32, %c0_i32_0 : i32, i32
  }
  func.func @transform_3(%arg0: i32) -> (i32, i32) {
    %c0_i32 = arith.constant 0 : i32
    %c0_i32_0 = arith.constant 0 : i32
    %c0_i32_1 = arith.constant 0 : i32
    return %c0_i32, %c0_i32_0 : i32, i32
  }
  func.func @transform_4(%arg0: i32) -> (i32, i32) {
    %c0_i32 = arith.constant 0 : i32
    %c0_i32_0 = arith.constant 0 : i32
    %c0_i32_1 = arith.constant 0 : i32
    return %c0_i32, %c0_i32_0 : i32, i32
  }
  func.func @transform_5(%arg0: i32) -> (i32, i32) {
    %c0_i32 = arith.constant 0 : i32
    %c0_i32_0 = arith.constant 0 : i32
    %c0_i32_1 = arith.constant 0 : i32
    return %c0_i32, %c0_i32_0 : i32, i32
  }
  func.func @transform_6(%arg0: i32) -> i32 {
    %c0_i32 = arith.constant 0 : i32
    %c0_i32_0 = arith.constant 0 : i32
    return %c0_i32 : i32
  }
  func.func @transform_7(%arg0: i32) -> (i32, i32) {
    %c0_i32 = arith.constant 0 : i32
    %c0_i32_0 = arith.constant 0 : i32
    return %c0_i32, %arg0 : i32, i32
  }
}

</mosaic_0001>

<bundles_post_ra>
// kernel: critic_forward.1
= control target key start
LH: loop header
LB: loop body
LE: loop exit
PB: predicated region body
PF: predicated region fallthrough
CT: control target
= control target key end

     0   :  { %13 = vsyncpa [#allocation4], 0  ;;  %s639_s0 = inlined_call_operand.vmem [shape: f32[32,128], index: 0, kind: input, shape index: {}]   ;;  %s640_s1 = inlined_call_operand.vmem [shape: f32[32,32], index: 1, kind: input, shape index: {}]   ;;  %s641_s2 = inlined_call_operand.vmem [shape: f32[32,1], index: 2, kind: input, shape index: {}]   ;;  %s642_s3 = inlined_call_operand.hbm [shape: f32[32,32], index: 3, kind: input, shape index: {}]   ;;  %s643_s4 = inlined_call_operand.vmem [shape: f32[32,1], index: 4, kind: input, shape index: {}]   ;;  %s644_s5 = inlined_call_operand.vmem [shape: f32[1,32], index: 5, kind: input, shape index: {}]   ;;  %s645_s6 = inlined_call_operand.<no memory space> [shape: f32[1], index: 6, kind: input, shape index: {}]   ;;  %s646_s7 = inlined_call_operand.hbm [shape: f32[1,128], index: 7, kind: output, shape index: {}]  }
   0x1   :  { %14 = vsyncpa [#allocation5], 0  ;;  %s523_s24 = smov [#allocation3]  }
   0x2   :  { %s26_s25 = sshll.u32 %s523_s24, 4  ;;  %s27_s25 = int_to_ptr.vmem [resolvable:$true] %s26_s25 }
   0x3   :  { %s487_s26 = scalar_lea.vmem %s27_s25, 512  ;;  %p492_p1 = scmp.lt.s32.totalorder %s27_s25, %s27_s25 }
   0x4   :  { %p488_p0 = scmp.ne.s32.totalorder %s27_s25, %s487_s26  ;;  %p493_p2 = scmp.lt.s32.totalorder %s487_s26, %s487_s26 }
   0x6   :  { %p494_p3 = por %p493_p2, %p492_p1 }
   0x8   :  { %p495_p4 = pnand %p494_p3, %p488_p0 }
   0xa   :  { %498 = shalt.err (!%p495_p4)
}
   0xb   :  { %s524_s27 = smov 128   ;;  %s525_s28 = smov 8  }
   0xc   :  { %32 = dma.hbm_to_vmem [thread:$0]  %s642_s3, 512, %s27_s25, [#allocation4], %s524_s27, %s524_s27, %s525_s28  }
   0xd   :  { %519 = dma.done.wait [#allocation4], 512  }
   0xe   :  { %520 = vsyncadd [#allocation4], 4294966784  ;;  %v526_v0 = vmov 0   ;;  %vm74_vm0 = vcmask 261120   ;;  %v45_v1 = vld [vmem:[%s639_s0 + $0x18] sm:$0xff]  ;;  %v44_v2 = vld [vmem:[%s639_s0 + $0x10] sm:$0xff]  ;;  %v311_v59 = vstv %s645_s6 }
   0xf   :  { %477 = vset.pattern.permute.xlu0 %v526_v0  ;;  %478 = vset.pattern.permute.xlu1 %v526_v0  ;;  %v46_v3 = vld [vmem:[%s640_s1] sm:$0xff]  ;;  %v43_v4 = vld [vmem:[%s639_s0 + $0x8] sm:$0xff]  ;;  %v53_v5 = vld [vmem:[%s641_s2 + $0x18] sm:$0xff]  ;;  %v527_v33 = vmov 0.0   ;;  %vm528_vm1 = vmmov 0   ;;  %s529_s15 = smov [#allocation6]  }
  0x10   :  { %431 = vmatprep.subr.mxu0 %v45_v1  ;;  %439 = vmatprep.mubr.msk.f32.mxu0 %vm74_vm0, %v46_v3  ;;  %v51_v6 = vld [vmem:[%s641_s2 + $0x8] sm:$0xff]  ;;  %v42_v7 = vld [vmem:[%s639_s0] sm:$0xff]  ;;  %v52_v8 = vld [vmem:[%s641_s2 + $0x10] sm:$0xff]  ;;  %s392_s16 = sshll.u32 %s529_s15, 4  ;;  %s393_s16 = int_to_ptr.vmem [resolvable:$true] %s392_s16 }
  0x11   :  { %432 = vmatpush3.msra.mxu0 %v45_v1  ;;  %71 = vperm.xlu0 %477, %v53_v5   ;;  %v50_v9 = vld [vmem:[%s641_s2] sm:$0xff]  ;;  %v47_v10 = vld [vmem:[%s640_s1 + $0x8] sm:$0xff]  ;;  %v48_v11 = vld [vmem:[%s640_s1 + $0x10] sm:$0xff]  ;;  %s499_s17 = scalar_lea.vmem %s393_s16, 16  ;;  %s503_s18 = scalar_lea.vmem %s393_s16, 32 }
  0x12   :  { %433 = vmatprep.subr.mxu0 %v44_v2  ;;  %61 = vperm.xlu1 %478, %v51_v6   ;;  %v183_v12 = vld [vmem:[%s643_s4 + $0x18] sm:$0xff]  ;;  %v182_v13 = vld [vmem:[%s643_s4 + $0x10] sm:$0xff]  ;;  %v181_v15 = vld [vmem:[%s643_s4 + $0x8] sm:$0xff]  ;;  %p500_p5 = scmp.ne.s32.totalorder %s393_s16, %s499_s17  ;;  %p504_p6 = scmp.lt.s32.totalorder %s393_s16, %s393_s16 }
  0x13   :  { %434 = vmatpush3.msra.mxu0 %v44_v2  ;;  %v49_v14 = vld [vmem:[%s640_s1 + $0x18] sm:$0xff]  ;;  %v180_v16 = vld [vmem:[%s643_s4] sm:$0xff]  ;;  %v177_v30 = vld [vmem:[#allocation3 + $0x8] sm:$0xff]  ;;  %p505_p7 = scmp.lt.s32.totalorder %s503_s18, %s499_s17 }
  0x14   :  { %435 = vmatprep.subr.mxu0 %v43_v4  ;;  %v176_v17 = vld [vmem:[#allocation3] sm:$0xff]  ;;  %v178_v31 = vld [vmem:[#allocation3 + $0x10] sm:$0xff]  ;;  %v179_v32 = vld [vmem:[#allocation3 + $0x18] sm:$0xff] }
  0x15   :  { %436 = vmatpush3.msra.mxu0 %v43_v4  ;;  %66 = vperm.xlu0 %477, %v52_v8   ;;  %v309_v58 = vld [vmem:[%s644_s5] sm:$0x1]  ;;  %p506_p8 = por %p505_p7, %p504_p6 }
  0x16   :  { %437 = vmatprep.subr.mxu0 %v42_v7  ;;  %56 = vperm.xlu1 %478, %v50_v9  }
  0x17   :  { %438 = vmatpush3.msra.mxu0 %v42_v7  ;;  %453 = vmatprep.mubr.msk.f32.mxu1 %vm74_vm0, %v176_v17  ;;  %p507_p9 = pnand %p506_p8, %p500_p5 }
  0x18   :  { %440 = vmatmul.mubr.msk.f32.vlgmr.msra.gmra.mxu0 %vm74_vm0, %v47_v10  ;;  %459 = vmatprep.subr.mxu0 %v527_v33 }
  0x19   :  { %442 = vmatprep.mubr.msk.f32.mxu0 %vm74_vm0, %v48_v11  ;;  %201 = vperm.xlu0 %477, %v183_v12  }
  0x1a   :  { %196 = vperm.xlu1 %478, %v182_v13  }
  0x1c   :  { %443 = vmatmul.mubr.msk.f32.gmra.mxu0 %vm74_vm0, %v49_v14 }
  0x1d   :  { %191 = vperm.xlu0 %477, %v181_v15   ;;  %467 = vmatprep.mubr.msk.f32.mxu0 %vm528_vm1, %v527_v33 }
  0x1e   :  { %186 = vperm.xlu1 %478, %v180_v16  }
  0x8c   :  { %v72_v18 = vpop.permute.xlu0 %71 }
  0x8d   :  { %v62_v21 = vpop.permute.xlu1 %61 }
  0x90   :  { %v67_v24 = vpop.permute.xlu0 %66 }
  0x91   :  { %v57_v28 = vpop.permute.xlu1 %56 }
  0x94   :  { %v202_v34 = vpop.permute.xlu0 %201 }
  0x95   :  { %v197_v35 = vpop.permute.xlu1 %196 }
  0x98   :  { %v192_v38 = vpop.permute.xlu0 %191 }
  0x99   :  { %v187_v42 = vpop.permute.xlu1 %186 }
  0xd8   :  { %v441_v19 = vpop.f32.mrf.mxu0 }
  0xd9   :  { %v159_v27 = vadd.f32 %v441_v19, %v62_v21 }
  0xda   :  { %v153_v20 = vpop.f32.mrf.mxu0 }
  0xdb   :  { %v154_v29 = vadd.f32 %v153_v20, %v57_v28  ;;  %v173_v52 = vmax.f32 %v159_v27, 0.0 }
  0xdc   :  { %v444_v22 = vpop.f32.mrf.mxu0 }
  0xdd   :  { %v169_v23 = vadd.f32 %v444_v22, %v72_v18  ;;  %v172_v56 = vmax.f32 %v154_v29, 0.0 }
  0xde   :  { %v163_v25 = vpop.f32.mrf.mxu0 }
  0xdf   :  { %v164_v26 = vadd.f32 %v163_v25, %v67_v24  ;;  %445 = vmatprep.subr.mxu1 %v169_v23  ;;  %v175_v45 = vmax.f32 %v169_v23, 0.0 }
  0xe0   :  { %446 = vmatpush3.msra.mxu1 %v169_v23 }
  0xe1   :  { %447 = vmatprep.subr.mxu1 %v164_v26  ;;  %v174_v50 = vmax.f32 %v164_v26, 0.0 }
  0xe2   :  { %448 = vmatpush3.msra.mxu1 %v164_v26 }
  0xe3   :  { %449 = vmatprep.subr.mxu1 %v159_v27 }
  0xe4   :  { %450 = vmatpush3.msra.mxu1 %v159_v27 }
  0xe5   :  { %451 = vmatprep.subr.mxu1 %v154_v29 }
  0xe6   :  { %452 = vmatpush3.msra.mxu1 %v154_v29 }
  0xe7   :  { %454 = vmatmul.mubr.msk.f32.vlgmr.msra.gmra.mxu1 %vm74_vm0, %v177_v30 }
  0xe8   :  { %456 = vmatprep.mubr.msk.f32.mxu1 %vm74_vm0, %v178_v31 }
  0xeb   :  { %457 = vmatmul.mubr.msk.f32.gmra.mxu1 %vm74_vm0, %v179_v32 }
 0x1a7   :  { %v455_v36 = vpop.f32.mrf.mxu1 }
 0x1a8   :  { %v288_v40 = vadd.f32 %v455_v36, %v192_v38 }
 0x1a9   :  { %v282_v37 = vpop.f32.mrf.mxu1 }
 0x1aa   :  { %v283_v44 = vadd.f32 %v282_v37, %v187_v42  ;;  %v302_v48 = vmax.f32 %v288_v40, 0.0 }
 0x1ab   :  { %v458_v39 = vpop.f32.mrf.mxu1 }
 0x1ac   :  { %v298_v41 = vadd.f32 %v458_v39, %v202_v34  ;;  %v301_v53 = vmax.f32 %v283_v44, 0.0  ;;  %v306_v55 = vadd.f32 %v302_v48, %v173_v52 }
 0x1ad   :  { %v292_v43 = vpop.f32.mrf.mxu1 }
 0x1ae   :  { %v304_v46 = vmax.f32 %v298_v41, 0.0  ;;  %v293_v47 = vadd.f32 %v292_v43, %v197_v35  ;;  %v305_v57 = vadd.f32 %v301_v53, %v172_v56 }
 0x1b0   :  { %v308_v49 = vadd.f32 %v304_v46, %v175_v45  ;;  %v303_v51 = vmax.f32 %v293_v47, 0.0 }
 0x1b2   :  { %v307_v54 = vadd.f32 %v303_v51, %v174_v50  ;;  %460 = vmatpush3.msra.mxu0 %v308_v49 }
 0x1b3   :  { %461 = vmatprep.subr.mxu0 %v527_v33 }
 0x1b4   :  { %462 = vmatpush3.msra.mxu0 %v307_v54 }
 0x1b5   :  { %463 = vmatprep.subr.mxu0 %v527_v33 }
 0x1b6   :  { %464 = vmatpush3.msra.mxu0 %v306_v55 }
 0x1b7   :  { %465 = vmatprep.subr.mxu0 %v527_v33 }
 0x1b8   :  { %466 = vmatpush3.msra.mxu0 %v305_v57 }
 0x1b9   :  { %468 = vmatmul.mubr.msk.f32.vlgmr.msra.gmra.mxu0 %vm74_vm0, %v309_v58 }
 0x279   :  { %v381_v60 = vpop.f32.mrf.mxu0 }
 0x27a   :  { %v382_v61 = vadd.f32 %v381_v60, %v311_v59 }
 0x27b   :  { %v469_v62 = vpop.f32.mrf.mxu0 }
 0x27c   :  { %385 = vst [vmem:[#allocation6] sm:$0x1] %v382_v61 }
 0x27d   :  { %510 = shalt.err (!%p507_p9)
}
 0x27e   :  { %395 = dma.vmem_to_hbm [thread:$0]  %s393_s16, 16, %s646_s7, [#allocation5]  }
 0x27f   :  { %521 = dma.done.wait [#allocation5], 16  }
 0x280   :  { %522 = vsyncadd [#allocation5], 4294967280 }
 0x281   :  { %399 = vsyncpa [#allocation4], 1 }
 0x282   :  { %400 = vsyncpa [#allocation5], 1 }

</bundles_post_ra>
